<compile_context>
chip_gen: v7x
topology: tpu7x:2x2x1
jax: 0.10.0
libtpu: 0.0.40
codegen_flags: <defaults>
</compile_context>

<pallas_src>
import functools

import jax
import jax.numpy as jnp
from jax.experimental import pallas as pl
from jax.experimental.pallas import tpu as pltpu

# OGB get_bond_feature_dims() -> [5, 6, 2]  (bond type, stereo, is_conjugated)
BOND_FEATURE_DIMS = (5, 6, 2)


def _round_up(x, m):
    return (x + m - 1) // m * m


def _bond_encoder_kernel(idx_ref, tab_ref, out_ref, *, nfeat, d_pad, pack):
    # idx_ref: (rows_tile, pack * nfeat) int32   -- `pack` edges per row
    # tab_ref: (pack * nfeat * d_pad, pack * emb) f32 block-diagonal table
    # out_ref: (rows_tile, pack * emb)
    rows = idx_ref.shape[0]
    d_tab = nfeat * d_pad
    width = pack * d_tab

    idx = idx_ref[...]  # single full-tile load, sliced in registers below
    # Invalid indices -> never match any lane (keeps "zero embedding" behavior).
    idx = jnp.where((idx >= 0) & (idx < d_pad), idx, jnp.int32(-(10 ** 6)))

    iota = jax.lax.broadcasted_iota(jnp.int32, (rows, width), 1)

    # Multi-hot: row r has a 1 at lane (s*d_tab + f*d_pad + idx[r, s*nfeat+f])
    # for each packed edge slot s and bond feature f.
    hot = None
    for k in range(pack * nfeat):  # static tiny loop (pack*nfeat = 12)
        s, f = divmod(k, nfeat)
        off = s * d_tab + f * d_pad
        match = iota == (idx[:, k:k + 1] + off)
        hot = match if hot is None else (hot | match)
    multihot = hot.astype(jnp.float32)

    # Single fused lookup: multi-hot matmul on the MXU, result already
    # lane-dense (pack edge embeddings per 128-lane row).
    out = jnp.dot(multihot, tab_ref[...], preferred_element_type=jnp.float32)
    out_ref[...] = out.astype(out_ref.dtype)


def bond_encoder(edge_attr, tables, *, tile_e=2048, out_dtype=jnp.float32):
    """Sum of per-feature embedding lookups (BondEncoder.forward).

    edge_attr: (E, nfeat) integer bond features.
    tables:    (nfeat, d_pad, emb) f32, rows beyond each feature dim zero-padded.
    Returns (E, emb) `out_dtype`.
    """
    E, nfeat = edge_attr.shape
    _, d_pad, emb = tables.shape

    # Pack `pack` consecutive edges into one 128-lane output row when possible.
    pack = 128 // emb if (emb < 128 and 128 % emb == 0) else 1

    # Tile sizing: multiple of 8*pack sublanes; clamp for tiny inputs; pad E.
    tile_e = max(8 * pack, min(tile_e, _round_up(E, 8 * pack)))
    tile_e = _round_up(tile_e, 8 * pack)
    e_pad = _round_up(E, tile_e)
    rows_total = e_pad // pack
    rows_tile = tile_e // pack

    idx = edge_attr.astype(jnp.int32)
    if e_pad != E:
        idx = jnp.pad(idx, ((0, e_pad - E), (0, 0)))  # pad rows use index 0, sliced off
    idx_packed = idx.reshape(rows_total, pack * nfeat)  # free contiguous reshape

    # Stack the per-feature tables and replicate block-diagonally so the packed
    # multi-hot matmul emits `pack` edge embeddings per output row.
    d_tab = nfeat * d_pad
    flat = tables.reshape(d_tab, emb).astype(jnp.float32)
    packed_tab = jnp.kron(jnp.eye(pack, dtype=jnp.float32), flat) if pack > 1 else flat
    tab_rows, tab_cols = pack * d_tab, pack * emb

    grid = (e_pad // tile_e,)
    kernel = functools.partial(_bond_encoder_kernel, nfeat=nfeat, d_pad=d_pad, pack=pack)

    cost = pl.CostEstimate(
        flops=2 * rows_total * tab_rows * tab_cols,
        transcendentals=0,
        bytes_accessed=(idx_packed.size * 4
                        + packed_tab.size * 4
                        + rows_total * tab_cols * jnp.dtype(out_dtype).itemsize),
    )

    out_packed = pl.pallas_call(
        kernel,
        out_shape=jax.ShapeDtypeStruct((rows_total, tab_cols), out_dtype),
        grid_spec=pltpu.PrefetchScalarGridSpec(
            num_scalar_prefetch=0,
            grid=grid,
            in_specs=[
                pl.BlockSpec((rows_tile, pack * nfeat), lambda i: (i, 0)),
                pl.BlockSpec((tab_rows, tab_cols), lambda i: (0, 0)),
            ],
            out_specs=pl.BlockSpec((rows_tile, tab_cols), lambda i: (i, 0)),
        ),
        compiler_params=pltpu.CompilerParams(
            dimension_semantics=("parallel",)),
        cost_estimate=cost,
    )(idx_packed, packed_tab)

    # (rows_total, pack*emb) -> (e_pad, emb) is a free row-major reshape.
    return out_packed.reshape(e_pad, emb)[:E]


if __name__ == "__main__":
    key = jax.random.PRNGKey(0)
    emb_dim = 32
    E = 200            # deliberately NOT a tile multiple -> exercises padding path
    d_pad = 8          # pad each table's row count up to a sublane multiple
    nfeat = len(BOND_FEATURE_DIMS)

    keys = jax.random.split(key, nfeat + 1)

    # Deterministic xavier_uniform init per embedding table (as in the module),
    # zero-padded to d_pad rows (padded rows are never indexed by valid data).
    tables = []
    for i, dim in enumerate(BOND_FEATURE_DIMS):
        bound = (6.0 / (dim + emb_dim)) ** 0.5
        w = jax.random.uniform(keys[i], (dim, emb_dim), jnp.float32, -bound, bound)
        tables.append(jnp.pad(w, ((0, d_pad - dim), (0, 0))))
    tables = jnp.stack(tables)  # (nfeat, d_pad, emb_dim)

    # Synthetic edge_attr: column i draws valid indices in [0, BOND_FEATURE_DIMS[i]).
    edge_attr = jnp.stack(
        [jax.random.randint(jax.random.fold_in(keys[-1], i), (E,), 0, d, jnp.int32)
         for i, d in enumerate(BOND_FEATURE_DIMS)],
        axis=1,
    )  # (E, nfeat) int32

    # Small tile here so the demo exercises a multi-step grid + tail padding;
    # production default is tile_e=2048.
    out = bond_encoder(edge_attr, tables, tile_e=64)
    out = jax.block_until_ready(out)

    # Pure-JAX reference: sum of table lookups.
    ref = sum(tables[i][edge_attr[:, i]] for i in range(nfeat))
    assert out.shape == (E, emb_dim) and out.dtype == jnp.float32
    assert jnp.allclose(out, ref, atol=1e-5), "mismatch vs reference"
    print("KERNEL_OK")
</pallas_src>

<mosaic_0001>
module attributes {stable_mosaic.version = 11 : i64} {
  func.func @_bond_encoder_kernel(%arg0: i32, %arg1: memref<16x12xi32, #tpu.memory_space<vmem>>, %arg2: memref<96x128xf32, #tpu.memory_space<vmem>>, %arg3: memref<16x128xf32, #tpu.memory_space<vmem>>) attributes {dimension_semantics = [#tpu.dimension_semantics<parallel>], iteration_bounds = array<i64: 4>, scalar_prefetch = 0 : i64, scratch_operands = 0 : i64, tpu.core_type = #tpu.core_type<tc>, window_params = [{transform_indices = @transform_0, window_bounds = array<i64: 16, 12>}, {pipeline_mode = #tpu.pipeline_mode<synchronous>, transform_indices = @transform_1, window_bounds = array<i64: 96, 128>}, {transform_indices = @transform_2, window_bounds = array<i64: 16, 128>}]} {
    %c0 = arith.constant 0 : index
    %c0_0 = arith.constant 0 : index
    %0 = vector.load %arg1[%c0, %c0_0] : memref<16x12xi32, #tpu.memory_space<vmem>>, vector<16x12xi32>
    %c0_i32 = arith.constant 0 : i32
    %1 = vector.broadcast %c0_i32 : i32 to vector<16x12xi32>
    %2 = arith.cmpi sge, %0, %1 : vector<16x12xi32>
    %c8_i32 = arith.constant 8 : i32
    %3 = vector.broadcast %c8_i32 : i32 to vector<16x12xi32>
    %4 = arith.cmpi slt, %0, %3 : vector<16x12xi32>
    %5 = arith.andi %2, %4 : vector<16x12xi1>
    %c-1000000_i32 = arith.constant -1000000 : i32
    %6 = vector.broadcast %c-1000000_i32 : i32 to vector<16x12xi32>
    %7 = arith.select %5, %0, %6 : vector<16x12xi1>, vector<16x12xi32>
    %8 = tpu.iota {dimensions = array<i32: 1>} : vector<16x96xi32>
    %9 = vector.extract_strided_slice %7 {offsets = [0, 0], sizes = [16, 1], strides = [1, 1]} : vector<16x12xi32> to vector<16x1xi32>
    %c0_i32_1 = arith.constant 0 : i32
    %10 = vector.broadcast %c0_i32_1 : i32 to vector<16x1xi32>
    %11 = arith.addi %9, %10 : vector<16x1xi32>
    %12 = vector.broadcast %11 : vector<16x1xi32> to vector<16x96xi32>
    %13 = arith.cmpi eq, %8, %12 : vector<16x96xi32>
    %14 = vector.extract_strided_slice %7 {offsets = [0, 1], sizes = [16, 1], strides = [1, 1]} : vector<16x12xi32> to vector<16x1xi32>
    %c8_i32_2 = arith.constant 8 : i32
    %15 = vector.broadcast %c8_i32_2 : i32 to vector<16x1xi32>
    %16 = arith.addi %14, %15 : vector<16x1xi32>
    %17 = vector.broadcast %16 : vector<16x1xi32> to vector<16x96xi32>
    %18 = arith.cmpi eq, %8, %17 : vector<16x96xi32>
    %19 = arith.ori %13, %18 : vector<16x96xi1>
    %20 = vector.extract_strided_slice %7 {offsets = [0, 2], sizes = [16, 1], strides = [1, 1]} : vector<16x12xi32> to vector<16x1xi32>
    %c16_i32 = arith.constant 16 : i32
    %21 = vector.broadcast %c16_i32 : i32 to vector<16x1xi32>
    %22 = arith.addi %20, %21 : vector<16x1xi32>
    %23 = vector.broadcast %22 : vector<16x1xi32> to vector<16x96xi32>
    %24 = arith.cmpi eq, %8, %23 : vector<16x96xi32>
    %25 = arith.ori %19, %24 : vector<16x96xi1>
    %26 = vector.extract_strided_slice %7 {offsets = [0, 3], sizes = [16, 1], strides = [1, 1]} : vector<16x12xi32> to vector<16x1xi32>
    %c24_i32 = arith.constant 24 : i32
    %27 = vector.broadcast %c24_i32 : i32 to vector<16x1xi32>
    %28 = arith.addi %26, %27 : vector<16x1xi32>
    %29 = vector.broadcast %28 : vector<16x1xi32> to vector<16x96xi32>
    %30 = arith.cmpi eq, %8, %29 : vector<16x96xi32>
    %31 = arith.ori %25, %30 : vector<16x96xi1>
    %32 = vector.extract_strided_slice %7 {offsets = [0, 4], sizes = [16, 1], strides = [1, 1]} : vector<16x12xi32> to vector<16x1xi32>
    %c32_i32 = arith.constant 32 : i32
    %33 = vector.broadcast %c32_i32 : i32 to vector<16x1xi32>
    %34 = arith.addi %32, %33 : vector<16x1xi32>
    %35 = vector.broadcast %34 : vector<16x1xi32> to vector<16x96xi32>
    %36 = arith.cmpi eq, %8, %35 : vector<16x96xi32>
    %37 = arith.ori %31, %36 : vector<16x96xi1>
    %38 = vector.extract_strided_slice %7 {offsets = [0, 5], sizes = [16, 1], strides = [1, 1]} : vector<16x12xi32> to vector<16x1xi32>
    %c40_i32 = arith.constant 40 : i32
    %39 = vector.broadcast %c40_i32 : i32 to vector<16x1xi32>
    %40 = arith.addi %38, %39 : vector<16x1xi32>
    %41 = vector.broadcast %40 : vector<16x1xi32> to vector<16x96xi32>
    %42 = arith.cmpi eq, %8, %41 : vector<16x96xi32>
    %43 = arith.ori %37, %42 : vector<16x96xi1>
    %44 = vector.extract_strided_slice %7 {offsets = [0, 6], sizes = [16, 1], strides = [1, 1]} : vector<16x12xi32> to vector<16x1xi32>
    %c48_i32 = arith.constant 48 : i32
    %45 = vector.broadcast %c48_i32 : i32 to vector<16x1xi32>
    %46 = arith.addi %44, %45 : vector<16x1xi32>
    %47 = vector.broadcast %46 : vector<16x1xi32> to vector<16x96xi32>
    %48 = arith.cmpi eq, %8, %47 : vector<16x96xi32>
    %49 = arith.ori %43, %48 : vector<16x96xi1>
    %50 = vector.extract_strided_slice %7 {offsets = [0, 7], sizes = [16, 1], strides = [1, 1]} : vector<16x12xi32> to vector<16x1xi32>
    %c56_i32 = arith.constant 56 : i32
    %51 = vector.broadcast %c56_i32 : i32 to vector<16x1xi32>
    %52 = arith.addi %50, %51 : vector<16x1xi32>
    %53 = vector.broadcast %52 : vector<16x1xi32> to vector<16x96xi32>
    %54 = arith.cmpi eq, %8, %53 : vector<16x96xi32>
    %55 = arith.ori %49, %54 : vector<16x96xi1>
    %56 = vector.extract_strided_slice %7 {offsets = [0, 8], sizes = [16, 1], strides = [1, 1]} : vector<16x12xi32> to vector<16x1xi32>
    %c64_i32 = arith.constant 64 : i32
    %57 = vector.broadcast %c64_i32 : i32 to vector<16x1xi32>
    %58 = arith.addi %56, %57 : vector<16x1xi32>
    %59 = vector.broadcast %58 : vector<16x1xi32> to vector<16x96xi32>
    %60 = arith.cmpi eq, %8, %59 : vector<16x96xi32>
    %61 = arith.ori %55, %60 : vector<16x96xi1>
    %62 = vector.extract_strided_slice %7 {offsets = [0, 9], sizes = [16, 1], strides = [1, 1]} : vector<16x12xi32> to vector<16x1xi32>
    %c72_i32 = arith.constant 72 : i32
    %63 = vector.broadcast %c72_i32 : i32 to vector<16x1xi32>
    %64 = arith.addi %62, %63 : vector<16x1xi32>
    %65 = vector.broadcast %64 : vector<16x1xi32> to vector<16x96xi32>
    %66 = arith.cmpi eq, %8, %65 : vector<16x96xi32>
    %67 = arith.ori %61, %66 : vector<16x96xi1>
    %68 = vector.extract_strided_slice %7 {offsets = [0, 10], sizes = [16, 1], strides = [1, 1]} : vector<16x12xi32> to vector<16x1xi32>
    %c80_i32 = arith.constant 80 : i32
    %69 = vector.broadcast %c80_i32 : i32 to vector<16x1xi32>
    %70 = arith.addi %68, %69 : vector<16x1xi32>
    %71 = vector.broadcast %70 : vector<16x1xi32> to vector<16x96xi32>
    %72 = arith.cmpi eq, %8, %71 : vector<16x96xi32>
    %73 = arith.ori %67, %72 : vector<16x96xi1>
    %74 = vector.extract_strided_slice %7 {offsets = [0, 11], sizes = [16, 1], strides = [1, 1]} : vector<16x12xi32> to vector<16x1xi32>
    %c88_i32 = arith.constant 88 : i32
    %75 = vector.broadcast %c88_i32 : i32 to vector<16x1xi32>
    %76 = arith.addi %74, %75 : vector<16x1xi32>
    %77 = vector.broadcast %76 : vector<16x1xi32> to vector<16x96xi32>
    %78 = arith.cmpi eq, %8, %77 : vector<16x96xi32>
    %79 = arith.ori %73, %78 : vector<16x96xi1>
    %80 = arith.extui %79 : vector<16x96xi1> to vector<16x96xi32>
    %81 = arith.sitofp %80 : vector<16x96xi32> to vector<16x96xf32>
    %c0_3 = arith.constant 0 : index
    %c0_4 = arith.constant 0 : index
    %82 = vector.load %arg2[%c0_3, %c0_4] : memref<96x128xf32, #tpu.memory_space<vmem>>, vector<96x128xf32>
    %cst = arith.constant dense<0.000000e+00> : vector<16x128xf32>
    %83 = tpu.matmul %81, %82, %cst {dimension_numbers = #tpu.dot_dimension_numbers<[1], [0], [0], [1], [0, 0, 1, 1], [], []>} : vector<16x96xf32>, vector<96x128xf32>, vector<16x128xf32> -> vector<16x128xf32>
    %c0_5 = arith.constant 0 : index
    %c0_6 = arith.constant 0 : index
    %84 = vector.load %arg3[%c0_5, %c0_6] : memref<16x128xf32, #tpu.memory_space<vmem>>, vector<16x128xf32>
    tpu.vector_store %arg3[%c0_5, %c0_6], %83 {strides = array<i32>} : memref<16x128xf32, #tpu.memory_space<vmem>>, vector<16x128xf32>,
    return
  }
  func.func @transform_0(%arg0: i32) -> (i32, i32) {
    %c0_i32 = arith.constant 0 : i32
    %c0_i32_0 = arith.constant 0 : i32
    return %arg0, %c0_i32 : i32, i32
  }
  func.func @transform_1(%arg0: i32) -> (i32, i32) {
    %c0_i32 = arith.constant 0 : i32
    %c0_i32_0 = arith.constant 0 : i32
    %c0_i32_1 = arith.constant 0 : i32
    return %c0_i32, %c0_i32_0 : i32, i32
  }
  func.func @transform_2(%arg0: i32) -> (i32, i32) {
    %c0_i32 = arith.constant 0 : i32
    %c0_i32_0 = arith.constant 0 : i32
    return %arg0, %c0_i32 : i32, i32
  }
}

</mosaic_0001>

<bundles_post_ra>
// kernel: tpu_custom_call.1
= control target key start
LH: loop header
LB: loop body
LE: loop exit
PB: predicated region body
PF: predicated region fallthrough
CT: control target
= control target key end

     0   :  { %7 = vsyncpa [#allocation3], 0  ;;  %s967_s0 = inlined_call_operand.vmem [shape: s32[64,12], index: 0, kind: input, shape index: {}]   ;;  %s968_s1 = inlined_call_operand.hbm [shape: f32[96,128], index: 1, kind: input, shape index: {}]   ;;  %s969_s2 = inlined_call_operand.hbm [shape: f32[64,128], index: 2, kind: output, shape index: {}]  }
   0x1   :  { %8 = vsyncpa [#allocation4], 0 }
   0x2   :  { %10 = vsyncpa [#allocation4 + $0x1], 0  ;;  %s802_s9 = smov 0   ;;  %s804_s10 = smov 0  }
   0x3   :  { %s806_s11 = smov 0   ;;  %s808_s12 = smov 0  }
   0x4 LB: > { %s823_s13 = sadd.s32 4294967295, %s766_s12   ;;  %s500_s14 = sadd.s32 4294967294, %s766_s12   ;;  %s766_s12 = sphi %s808_s12, %s985_s12   ;;  %s762_s11 = sphi %s806_s11, %s984_s11   ;;  %s758_s10 = sphi %s804_s10, %s983_s10   ;;  %s754_s9 = sphi %s802_s9, %s982_s9  }
   0x5   : > { %s827_s15 = sadd.s32 1, %s766_s12   ;;  %s70_s16 = sadd.s32 1, %s762_s11 }
   0x6   : > { %s67_s17 = ssub.s32 %s766_s12, %s827_s15  ;;  %p80_p0 = scmp.ne.s32.totalorder %s762_s11, %s758_s10 }
   0x7   : > { %p68_p1 = scmp.eq.s32.totalorder %s67_s17, 0  ;;  %p81_p2 = scmp.eq.s32.totalorder %s823_s13, 3 }
   0x8   : > { %p86_p3 = scmp.ne.s32.totalorder %s758_s10, %s754_s9  ;;  %p87_p4 = scmp.eq.s32.totalorder %s500_s14, 3 }
   0x9   : > { %s838_s18 = scalar_select %p68_p1, %s762_s11, %s70_s16  }
   0xa   : > { %p840_p5 = por %p81_p2, %p80_p0  ;;  %p844_p6 = por %p87_p4, %p86_p3 }
   0xb   : > { %p501_p7 = scmp.ge.s32.totalorder %s766_s12, 1  ;;  %p94_p8 = scmp.lt.s32.totalorder %s766_s12, 5 }
   0xc   : > { %s973_s19 = scalar_select %p840_p5, 1, 0 }
   0xd   : > { %s974_s20 = scalar_select %p844_p6, 1, 0 }
   0xe   : > { %p970_p9 = scmp.eq.s32.totalorder %s823_s13, 0  ;;  %p851_p10 = pnand %p501_p7, %p94_p8 }
   0xf   : > { %s768_s22 = smov [#allocation2]   ;;  %s672_s27 = scalar_lea.hbm %s968_s1, 1536 }
  0x10   : > { %s975_s21 = scalar_select %p851_p10, 1, 0 }
  0x11   : > { %s106_s23 = sshll.u32 %s768_s22, 4  ;;  %p590_p11 = pneg %p851_p10  ;;  %s107_s23 = int_to_ptr.vmem [resolvable:$true] %s106_s23 }
  0x12   : > { %p673_p13 = scmp.ne.s32.totalorder %s968_s1, %s672_s27  ;;  %p679_p3 = scmp.lt.u32.totalorder %s672_s27, %s968_s1 }
  0x13   : > { %p859_p12 = pnand %p970_p9, %p590_p11 }
  0x15   : > { %p674_p0 = pneg %p859_p12 }
  0x17   : > { %p675_p1 = pnand %p674_p0, %p673_p13 }
  0x19   : > { %p676_p2 = pneg %p675_p1 }
  0x1b   : > { %p681_p4 = pnand %p679_p3, %p676_p2 }
  0x1d   : > { %684 = shalt.err (!%p681_p4)
}
  0x1e   : > { %s685_s4 = scalar_lea.vmem %s107_s23, 1536  ;;  %p693_p9 = scmp.lt.s32.totalorder %s107_s23, %s107_s23 }
  0x1f   : > { %p686_p7 = scmp.ne.s32.totalorder %s107_s23, %s685_s4  ;;  %p694_p6 = scmp.lt.s32.totalorder %s685_s4, %s685_s4 }
  0x21   : > { %p688_p8 = pnand %p686_p7, %p674_p0  ;;  %p695_p5 = por %p694_p6, %p693_p9 }
  0x23   : > { %p689_p11 = pneg %p688_p8 }
  0x25   : > { %p696_p10 = pnand %p695_p5, %p689_p11 }
  0x27   : > { %699 = shalt.err (!%p696_p10)
}
  0x28   : > { %s769_s5 = smov 128   ;;  %s770_s6 = smov 8  }
  0x29   : > { %593 = dma.hbm_to_vmem [thread:$0]  (!%p859_p12), %s968_s1, 1536, %s107_s23, [#allocation3], %s769_s5, %s769_s5, %s770_s6  }
  0x2a   : > { %p977_p13 = scmp.ne.s32.totalorder %s975_s21, 0 }
  0x2b   : > { %p978_p1 = scmp.eq.s32.totalorder (!%p977_p13), %s823_s13, 0 }
  0x2c   : > { %131 = sbr.rel (%p977_p13) target bundleno = 489 (0x1e9), region = 28 }
  0x33   : > { %745 = dma.done.wait (%p978_p1), [#allocation3], 1536   ;;  %p979_p0 = pmov %p978_p1 }
  0x34   : > { %s507_s14 = sshll.u32 %s823_s13, 1  ;;  %v771_v0 = vmov 0   ;;  %v772_v7 = vmov 1   ;;  %v773_v10 = vmov 2   ;;  %v774_v13 = vmov 3   ;;  %v316_v33 = vld [vmem:[#allocation2] sm:$0xff] }
  0x35   : > { %747 = vsyncadd (%p979_p0), [#allocation3], 4294965760  ;;  %652 = vset.pattern.permute.xlu1 %v771_v0  ;;  %651 = vset.pattern.permute.xlu0 %v771_v0  ;;  %p154_p5 = scmp.lt.s32.totalorder %s507_s14, 7  ;;  %v775_v14 = vmov 4   ;;  %v776_v18 = vmov 5   ;;  %v777_v21 = vmov 7  }
  0x36   : > { %v778_v24 = vmov 8   ;;  %v779_v26 = vmov 6   ;;  %v780_v28 = vmov 10   ;;  %v781_v31 = vmov 11   ;;  %v317_v34 = vld [vmem:[#allocation2 + $0x8] sm:$0xff]  ;;  %v318_v37 = vld [vmem:[#allocation2 + $0x10] sm:$0xff] }
  0x37   : > { %s987_s14 = smov (!%p154_p5, %s507_s14), 7  ;;  %v560_v35 = vpack.c.bf16 %v317_v34, %v316_v33  ;;  %v319_v38 = vld [vmem:[#allocation2 + $0x18] sm:$0xff]  ;;  %v782_v40 = vmov 9   ;;  %v320_v42 = vld [vmem:[#allocation2 + $0x20] sm:$0xff]  ;;  %v321_v43 = vld [vmem:[#allocation2 + $0x28] sm:$0xff]  ;;  %s150_s21 = sand.u32 1, %s758_s10  }
  0x38   : > { %s508_s16 = sshll.u32 %s987_s14, 3  ;;  %v564_v39 = vpack.c.bf16 %v319_v38, %v318_v37  ;;  %v568_v44 = vpack.c.bf16 %v321_v43, %v320_v42  ;;  %v322_v45 = vld [vmem:[#allocation2 + $0x30] sm:$0xff]  ;;  %v323_v46 = vld [vmem:[#allocation2 + $0x38] sm:$0xff]  ;;  %v324_v49 = vld [vmem:[#allocation2 + $0x40] sm:$0xff]  ;;  %s506_s24 = sshll.u32 %s150_s21, 4 }
  0x39   : > { %s157_s23 = scalar_lea.vmem %s967_s0, %s508_s16  ;;  %561 = vmatprep.subr.bf16.mxu0 %v560_v35  ;;  %v572_v48 = vpack.c.bf16 %v323_v46, %v322_v45  ;;  %v325_v50 = vld [vmem:[#allocation2 + $0x48] sm:$0xff]  ;;  %v326_v53 = vld [vmem:[#allocation2 + $0x50] sm:$0xff]  ;;  %v327_v54 = vld [vmem:[#allocation2 + $0x58] sm:$0xff]  ;;  %s152_s25 = scalar_lea.vmem [#allocation5], %s506_s24 }
  0x3a   : > { %v161_v1 = vld [vmem:[%s157_s23 + $0x8] sm:$0xff]  ;;  %v160_v2 = vld [vmem:[%s157_s23] sm:$0xff]  ;;  %563 = vmatpush3.bf16.msra.mxu0 %v560_v35  ;;  %v576_v51 = vpack.c.bf16 %v325_v50, %v324_v49  ;;  %v580_v55 = vpack.c.bf16 %v327_v54, %v326_v53  ;;  %s426_s26 = sshll.u32 %s152_s25, 4  ;;  %s518_s27 = sshll.u32 %s823_s13, 8  ;;  %s919_s26 = int_to_ptr.vmem [resolvable:$true] %s426_s26 }
  0x3b   : > { %vm163_vm0 = vcmp.ge.s32.totalorder %v161_v1, 0  ;;  %vm165_vm1 = vcmp.lt.s32.totalorder %v161_v1, 8  ;;  %vm162_vm2 = vcmp.ge.s32.totalorder %v160_v2, 0  ;;  %vm164_vm3 = vcmp.lt.s32.totalorder %v160_v2, 8  ;;  %565 = vmatprep.subr.bf16.mxu0 %v564_v39  ;;  %s924_s30 = scalar_lea.hbm %s969_s2, %s518_s27  ;;  %s926_s3 = scalar_lea.sflag [#allocation4], %s150_s21 }
  0x3c   : > { %vm167_vm4 = vmand %vm163_vm0, %vm165_vm1  ;;  %s700_s4 = scalar_lea.vmem %s919_s26, 256  ;;  %p980_p9 = scmp.ne.s32.totalorder %s973_s19, 0 }
  0x3d   : > { %v889_v3 = vsel %vm167_vm4, %v161_v1, 4293967296  ;;  %vm166_vm5 = vmand %vm162_vm2, %vm164_vm3  ;;  %p701_p6 = scmp.ne.s32.totalorder %s919_s26, %s700_s4  ;;  %s784_s13 = smov [#allocation5]  }
  0x3e   : > { %176 = vperm.xlu1 %652, %v889_v3   ;;  %v892_v4 = vsel %vm166_vm5, %v160_v2, 4293967296  ;;  %v181_v5 = vadd.s32 8, %v889_v3  ;;  %v193_v9 = vadd.s32 16, %v889_v3  ;;  %v205_v15 = vadd.s32 24, %v889_v3  ;;  %567 = vmatpush3.bf16.msra.mxu0 %v564_v39  ;;  %s704_s5 = sshll.u32 %s784_s13, 4  ;;  %s705_s5 = int_to_ptr.vmem [resolvable:$false] %s704_s5 }
  0x3f   : > { %173 = vperm.xlu0 %651, %v892_v4   ;;  %v180_v6 = vadd.s32 8, %v892_v4  ;;  %v192_v8 = vadd.s32 16, %v892_v4  ;;  %v204_v11 = vadd.s32 24, %v892_v4  ;;  %v216_v12 = vadd.s32 32, %v892_v4  ;;  %569 = vmatprep.subr.bf16.mxu0 %v568_v44  ;;  %p702_p10 = pnand %p701_p6, %p980_p9  ;;  %s706_s6 = scalar_lea.vmem %s705_s5, 512 }
  0x40   : > { %v229_v16 = vadd.s32 40, %v889_v3  ;;  %v217_v17 = vadd.s32 32, %v889_v3  ;;  %v252_v19 = vadd.s32 56, %v892_v4  ;;  %v228_v20 = vadd.s32 40, %v892_v4  ;;  %p707_p2 = scmp.lt.s32.totalorder %s919_s26, %s705_s5  ;;  %p708_p3 = scmp.lt.s32.totalorder %s706_s6, %s700_s4 }
  0x41   : > { %v265_v22 = vadd.s32 64, %v889_v3  ;;  %v240_v23 = vadd.s32 48, %v892_v4  ;;  %v288_v25 = vadd.s32 80, %v892_v4  ;;  %v241_v27 = vadd.s32 48, %v889_v3  ;;  %p703_p12 = pneg %p702_p10 }
  0x42   : > { %654 = vset.pattern.permute.xlu1 %v772_v7  ;;  %v301_v29 = vadd.s32 88, %v889_v3  ;;  %v253_v30 = vadd.s32 56, %v889_v3  ;;  %v264_v32 = vadd.s32 64, %v892_v4  ;;  %v276_v36 = vadd.s32 72, %v892_v4  ;;  %571 = vmatpush3.bf16.msra.mxu0 %v568_v44  ;;  %p709_p4 = por %p708_p3, %p707_p2 }
  0x43   : > { %653 = vset.pattern.permute.xlu0 %v772_v7  ;;  %186 = vperm.xlu1 %654, %v181_v5   ;;  %v277_v41 = vadd.s32 72, %v889_v3  ;;  %v289_v47 = vadd.s32 80, %v889_v3  ;;  %v300_v52 = vadd.s32 88, %v892_v4  ;;  %v170_v2 = vlaneseq }
  0x44   : > { %183 = vperm.xlu0 %653, %v180_v6   ;;  %573 = vmatprep.subr.bf16.mxu0 %v572_v48  ;;  %p710_p7 = pnand %p709_p4, %p703_p12 }
  0x45   : > { %v171_v5 = vand.u32 127, %v170_v2 }
  0x46   : > { %575 = vmatpush3.bf16.msra.mxu0 %v572_v48 }
  0x47   : > { %655 = vset.pattern.permute.xlu1 %v773_v10  ;;  %577 = vmatprep.subr.bf16.mxu0 %v576_v51 }
  0x48   : > { %656 = vset.pattern.permute.xlu0 %v773_v10  ;;  %195 = vperm.xlu1 %655, %v192_v8  }
  0x49   : > { %198 = vperm.xlu0 %656, %v193_v9  }
  0x4a   : > { %579 = vmatpush3.bf16.msra.mxu0 %v576_v51 }
  0x4b   : > { %581 = vmatprep.subr.bf16.mxu0 %v580_v55 }
  0x4c   : > { %657 = vset.pattern.permute.xlu1 %v774_v13 }
  0x4d   : > { %207 = vperm.xlu1 %657, %v204_v11   ;;  %658 = vset.pattern.permute.xlu0 %v775_v14 }
  0x4e   : > { %219 = vperm.xlu0 %658, %v216_v12   ;;  %583 = vmatpush3.bf16.msra.mxu0 %v580_v55 }
  0x51   : > { %210 = vperm.xlu1 %657, %v205_v15  }
  0x52   : > { %661 = vset.pattern.permute.xlu0 %v776_v18 }
  0x53   : > { %234 = vperm.xlu0 %661, %v229_v16  }
  0x55   : > { %659 = vset.pattern.permute.xlu1 %v775_v14 }
  0x56   : > { %222 = vperm.xlu1 %659, %v217_v17  }
  0x57   : > { %663 = vset.pattern.permute.xlu0 %v777_v21 }
  0x58   : > { %255 = vperm.xlu0 %663, %v252_v19  }
  0x5a   : > { %660 = vset.pattern.permute.xlu1 %v776_v18  ;;  %v783_v18 = vmov 0.0  }
  0x5b   : > { %231 = vperm.xlu1 %660, %v228_v20  }
  0x5c   : > { %666 = vset.pattern.permute.xlu0 %v778_v24 }
  0x5d   : > { %270 = vperm.xlu0 %666, %v265_v22  }
  0x5f   : > { %662 = vset.pattern.permute.xlu1 %v779_v26 }
  0x60   : > { %243 = vperm.xlu1 %662, %v240_v23  }
  0x61   : > { %668 = vset.pattern.permute.xlu0 %v780_v28 }
  0x62   : > { %291 = vperm.xlu0 %668, %v288_v25  }
  0x64   : > { %246 = vperm.xlu1 %662, %v241_v27  }
  0x66   : > { %671 = vset.pattern.permute.xlu0 %v781_v31 }
  0x67   : > { %306 = vperm.xlu0 %671, %v301_v29  }
  0x68   : > { %664 = vset.pattern.permute.xlu1 %v777_v21 }
  0x69   : > { %258 = vperm.xlu1 %664, %v253_v30  }
  0x6d   : > { %665 = vset.pattern.permute.xlu1 %v778_v24 }
  0x6e   : > { %267 = vperm.xlu1 %665, %v264_v32  }
  0x72   : > { %667 = vset.pattern.permute.xlu1 %v782_v40 }
  0x73   : > { %279 = vperm.xlu1 %667, %v276_v36  }
  0x77   : > { %282 = vperm.xlu1 %667, %v277_v41  }
  0x7b   : > { %669 = vset.pattern.permute.xlu1 %v780_v28 }
  0x7c   : > { %294 = vperm.xlu1 %669, %v289_v47  }
  0x80   : > { %670 = vset.pattern.permute.xlu1 %v781_v31 }
  0x81   : > { %303 = vperm.xlu1 %670, %v300_v52  }
  0xbd   : > { %v177_v56 = vpop.permute.xlu1 %176 }
  0xbe   : > { %v174_v62 = vpop.permute.xlu0 %173  ;;  %vm179_vm11 = vcmp.eq.s32.totalorder %v171_v5, %v177_v56 }
  0xbf   : > { %vm178_vm6 = vcmp.eq.s32.totalorder %v171_v5, %v174_v62 }
  0xc2   : > { %v187_v57 = vpop.permute.xlu1 %186 }
  0xc3   : > { %v184_v0 = vpop.permute.xlu0 %183  ;;  %vm189_vm8 = vcmp.eq.s32.totalorder %v171_v5, %v187_v57 }
  0xc4   : > { %vm188_vm7 = vcmp.eq.s32.totalorder %v171_v5, %v184_v0  ;;  %vm191_vm13 = vmor %vm179_vm11, %vm189_vm8 }
  0xc5   : > { %vm190_vm9 = vmor %vm178_vm6, %vm188_vm7 }
  0xc7   : > { %v196_v58 = vpop.permute.xlu1 %195 }
  0xc8   : > { %v199_v3 = vpop.permute.xlu0 %198  ;;  %vm200_vm10 = vcmp.eq.s32.totalorder %v171_v5, %v196_v58 }
  0xc9   : > { %vm201_vm12 = vcmp.eq.s32.totalorder %v171_v5, %v199_v3  ;;  %vm202_vm15 = vmor %vm190_vm9, %vm200_vm10 }
  0xca   : > { %vm203_vm1 = vmor %vm191_vm13, %vm201_vm12 }
  0xcc   : > { %v208_v59 = vpop.permute.xlu1 %207 }
  0xcd   : > { %v220_v6 = vpop.permute.xlu0 %219  ;;  %vm212_vm14 = vcmp.eq.s32.totalorder %v171_v5, %v208_v59 }
  0xce   : > { %vm214_vm3 = vmor %vm202_vm15, %vm212_vm14  ;;  %vm224_vm4 = vcmp.eq.s32.totalorder %v171_v5, %v220_v6 }
  0xcf   : > { %vm226_vm11 = vmor %vm214_vm3, %vm224_vm4 }
  0xd0   : > { %v211_v60 = vpop.permute.xlu1 %210 }
  0xd1   : > { %vm213_vm0 = vcmp.eq.s32.totalorder %v171_v5, %v211_v60 }
  0xd2   : > { %v235_v8 = vpop.permute.xlu0 %234  ;;  %vm215_vm5 = vmor %vm203_vm1, %vm213_vm0 }
  0xd3   : > { %vm237_vm7 = vcmp.eq.s32.totalorder %v171_v5, %v235_v8 }
  0xd5   : > { %v223_v61 = vpop.permute.xlu1 %222 }
  0xd6   : > { %vm225_vm2 = vcmp.eq.s32.totalorder %v171_v5, %v223_v61 }
  0xd7   : > { %v256_v10 = vpop.permute.xlu0 %255  ;;  %vm227_vm6 = vmor %vm215_vm5, %vm225_vm2 }
  0xd8   : > { %vm239_vm10 = vmor %vm227_vm6, %vm237_vm7  ;;  %vm260_vm0 = vcmp.eq.s32.totalorder %v171_v5, %v256_v10 }
  0xda   : > { %v232_v63 = vpop.permute.xlu1 %231 }
  0xdb   : > { %vm236_vm8 = vcmp.eq.s32.totalorder %v171_v5, %v232_v63 }
  0xdc   : > { %v271_v12 = vpop.permute.xlu0 %270  ;;  %vm238_vm13 = vmor %vm226_vm11, %vm236_vm8 }
  0xdd   : > { %vm273_vm5 = vcmp.eq.s32.totalorder %v171_v5, %v271_v12 }
  0xdf   : > { %v244_v1 = vpop.permute.xlu1 %243 }
  0xe0   : > { %vm248_vm9 = vcmp.eq.s32.totalorder %v171_v5, %v244_v1 }
  0xe1   : > { %vm250_vm15 = vmor %vm238_vm13, %vm248_vm9  ;;  %v292_v14 = vpop.permute.xlu0 %291 }
  0xe2   : > { %vm262_vm4 = vmor %vm250_vm15, %vm260_vm0 }
  0xe3   : > { %v247_v4 = vpop.permute.xlu1 %246 }
  0xe4   : > { %vm249_vm12 = vcmp.eq.s32.totalorder %v171_v5, %v247_v4 }
  0xe5   : > { %vm251_vm1 = vmor %vm239_vm10, %vm249_vm12  ;;  %vm296_vm10 = vcmp.eq.s32.totalorder %v171_v5, %v292_v14 }
  0xe6   : > { %v307_v16 = vpop.permute.xlu0 %306 }
  0xe8   : > { %v259_v7 = vpop.permute.xlu1 %258 }
  0xe9   : > { %vm261_vm14 = vcmp.eq.s32.totalorder %v171_v5, %v259_v7 }
  0xea   : > { %vm263_vm2 = vmor %vm251_vm1, %vm261_vm14  ;;  %vm309_vm14 = vcmp.eq.s32.totalorder %v171_v5, %v307_v16 }
  0xeb   : > { %vm275_vm7 = vmor %vm263_vm2, %vm273_vm5  ;;  %vm328_vm5 = vcmask 785408  }
  0xed   : > { %v268_v9 = vpop.permute.xlu1 %267 }
  0xee   : > { %vm272_vm3 = vcmp.eq.s32.totalorder %v171_v5, %v268_v9 }
  0xef   : > { %vm274_vm11 = vmor %vm262_vm4, %vm272_vm3 }
  0xf2   : > { %v280_v11 = vpop.permute.xlu1 %279 }
  0xf3   : > { %vm284_vm6 = vcmp.eq.s32.totalorder %v171_v5, %v280_v11 }
  0xf4   : > { %vm286_vm9 = vmor %vm274_vm11, %vm284_vm6 }
  0xf5   : > { %vm298_vm0 = vmor %vm286_vm9, %vm296_vm10 }
  0xf6   : > { %v283_v13 = vpop.permute.xlu1 %282 }
  0xf7   : > { %vm285_vm8 = vcmp.eq.s32.totalorder %v171_v5, %v283_v13 }
  0xf8   : > { %vm287_vm12 = vmor %vm275_vm7, %vm285_vm8 }
  0xfb   : > { %v295_v15 = vpop.permute.xlu1 %294 }
  0xfc   : > { %vm297_vm13 = vcmp.eq.s32.totalorder %v171_v5, %v295_v15 }
  0xfd   : > { %vm299_vm1 = vmor %vm287_vm12, %vm297_vm13 }
  0xfe   : > { %vm311_vm15 = vmor %vm299_vm1, %vm309_vm14 }
  0xff   : > { %v510_v20 = vsel %vm311_vm15, 1.0, %v783_v18 }
 0x100   : > { %v304_v17 = vpop.permute.xlu1 %303 }
 0x101   : > { %vm308_vm2 = vcmp.eq.s32.totalorder %v171_v5, %v304_v17 }
 0x102   : > { %vm310_vm3 = vmor %vm298_vm0, %vm308_vm2 }
 0x103   : > { %v509_v19 = vsel %vm310_vm3, 1.0, %v783_v18 }
 0x104   : > { %557 = vmatprep.mubr.msk.f32.mxu0 %vm328_vm5, %v509_v19 }
 0x105   : > { %558 = vmatmul.mubr.msk.f32.vlgmr.msra.gmra.mrb[0].mxu0 %vm328_vm5, %v510_v20 }
 0x1d8   : > { %v559_v21 = vpop.f32.mrb[0].mxu0 }
 0x1d9   : > { %411 = vst [vmem:[%s152_s25 + $0x8] sm:$0xff] %v559_v21  ;;  %v401_v22 = vpop.f32.mrb[1].mxu0 }
 0x1da   : > { %410 = vst [vmem:[%s152_s25] sm:$0xff] %v401_v22 }
 0x1db   : > { %713 = shalt.err (!%p710_p7)
}
 0x1dc   : > { %s714_s7 = scalar_lea.hbm %s924_s30, 256  ;;  %s718_s16 = scalar_lea.hbm %s969_s2, 1024 }
 0x1dd   : > { %p715_p8 = scmp.ne.s32.totalorder %s924_s30, %s714_s7  ;;  %p719_p1 = scmp.lt.u32.totalorder %s924_s30, %s969_s2 }
 0x1de   : > { %p720_p0 = scmp.lt.u32.totalorder %s718_s16, %s714_s7  ;;  %p722_p6 = scmp.lt.u32.totalorder %s714_s7, %s924_s30 }
 0x1df   : > { %p716_p11 = pnand %p715_p8, %p980_p9 }
 0x1e0   : > { %p721_p5 = por %p720_p0, %p719_p1 }
 0x1e1   : > { %p717_p13 = pneg %p716_p11 }
 0x1e2   : > { %p723_p10 = por %p722_p6, %p721_p5 }
 0x1e4   : > { %p724_p12 = pnand %p723_p10, %p717_p13 }
 0x1e6   : > { %727 = shalt.err (!%p724_p12)
}
 0x1e7   : > { %s785_s23 = smov 128   ;;  %s786_s21 = smov 8  }
 0x1e8   : > { %588 = dma.vmem_to_hbm [thread:$0]  (%p980_p9), %s919_s26, 256, %s924_s30, %s926_s3, %s785_s23, %s785_s23, %s786_s21  }
 0x1e9 PF: > { %p600_p2 = scmp.ge.s32.totalorder %s766_s12, 2  ;;  %s441_s24 = sand.u32 1, %s754_s9  }
 0x1ea   : > { %p981_p3 = scmp.ne.s32.totalorder %s974_s20, 0  ;;  %s442_s25 = scalar_lea.sflag [#allocation4], %s441_s24 }
 0x1ec   : > { %p595_p4 = pnand %p600_p2, %p981_p3 }
 0x1ee   : > { %749 = dma.done.wait (!%p595_p4), %s442_s25, 256  }
 0x1ef   : > { %751 = vsyncadd (!%p595_p4), %s442_s25, 4294967040  ;;  %p13_p7 = scmp.ge.s32.totalorder %s827_s15, 6   ;;  %s982_s9 = smov %s758_s10 }
 0x1f0   : > { %s983_s10 = smov %s762_s11  ;;  %s984_s11 = smov %s838_s18 }
 0x1f1   : > { %s985_s12 = smov %s827_s15  ;;  %15 = sbr.rel (!%p13_p7) target bundleno = 4 (0x4), region = 68 }
 0x1f8   :  { %447 = vsyncpa [#allocation3], 1 }
 0x1f9   :  { %449 = vsyncpa [#allocation3 + $0x1], 1 }
 0x1fa   :  { %450 = vsyncpa [#allocation4], 1 }
 0x1fb   :  { %452 = vsyncpa [#allocation4 + $0x1], 1 }

</bundles_post_ra>
